<compile_context>
chip_gen: v7x
topology: tpu7x:2x2x1
jax: 0.10.0
libtpu: 0.0.40
codegen_flags: <defaults>
</compile_context>

<pallas_src>
import functools

import jax
import jax.numpy as jnp
from jax.experimental import pallas as pl
from jax.experimental.pallas import tpu as pltpu


LAYERS = [784, 100, 10, 100, 10, 100, 10]   # input_size = 28*28, output_size = 10
LANE = 128


def _round_up(n, m):
    return ((n + m - 1) // m) * m


# ----------------------------- Pallas kernel -----------------------------

def _fused_mlp_kernel(x_ref, w0_ref, wh_ref, b_ref, o_ref, *, num_layers):
    # x_ref : (bb, 784)        bf16   batch tile, natural input width
    # w0_ref: (784, 128)       bf16   layer-0 weight (out dim zero-padded to 128)
    # wh_ref: (L-1, 128, 128)  bf16   stacked hidden/output weights (zero-padded)
    # b_ref : (L, 128)         f32    stacked biases (zero-padded)
    # o_ref : (bb, 128)        f32    padded output tile
    h = x_ref[...]                                            # bf16 activations
    acc = None
    for l in range(num_layers):
        w = w0_ref[...] if l == 0 else wh_ref[l - 1]          # bf16 VMEM-resident tile
        # bf16 MXU matmul, f32 accumulation; bias add in f32.
        acc = jnp.dot(h, w, preferred_element_type=jnp.float32) + b_ref[l:l + 1, :]
        if l < num_layers - 1:
            acc = jnp.maximum(acc, 0.0)                       # ReLU in f32 (v5e: no bf16 VPU)
            h = acc.astype(jnp.bfloat16)                      # downcast only for the next matmul
    o_ref[...] = acc.astype(o_ref.dtype)


# ----------------------------- Parameter handling -----------------------------

def init_params(key, layers):
    """Unpadded f32 (in, out) weights + (out,) biases, kaiming-uniform like the spec."""
    params = []
    for in_size, out_size in zip(layers, layers[1:]):
        key, wk, bk = jax.random.split(key, 3)
        # kaiming_uniform_(nonlinearity='relu'): bound = sqrt(2) * sqrt(3 / fan_in)
        w_bound = jnp.sqrt(6.0 / jnp.float32(in_size))
        # PyTorch default bias init: uniform(-1/sqrt(fan_in), 1/sqrt(fan_in))
        b_bound = 1.0 / jnp.sqrt(jnp.float32(in_size))
        w = jax.random.uniform(wk, (in_size, out_size), jnp.float32, -w_bound, w_bound)
        b = jax.random.uniform(bk, (out_size,), jnp.float32, -b_bound, b_bound)
        params.append((w, b))
    return params


def pack_params(params):
    """Pack parameters for the fused kernel.

    * Layer-0 weight keeps its natural 784 input dim (so x needs no 784->896 pad
      copy); only its output dim is zero-padded to 128.  Stored in bf16.
    * All hidden/output feature dims (100, 10) pad to one 128-lane tile, so the
      remaining weights stack into a single (L-1, 128, 128) bf16 array and the
      biases into a single (L, 128) f32 array (bias add runs in the f32 accum).
    Zero padding keeps numerics exact: padded lanes receive 0 contributions + 0
    bias, ReLU(0)=0 keeps them inert, and the final slice drops them.
    """
    w0, _ = params[0]
    in0, out0 = w0.shape
    out_pad = _round_up(out0, LANE)
    w0_p = jnp.zeros((in0, out_pad), jnp.bfloat16).at[:, :out0].set(w0.astype(jnp.bfloat16))

    wh = []
    for w, _ in params[1:]:
        in_f, out_f = w.shape
        assert _round_up(in_f, LANE) == LANE and _round_up(out_f, LANE) == LANE
        wh.append(
            jnp.zeros((LANE, LANE), jnp.bfloat16).at[:in_f, :out_f].set(w.astype(jnp.bfloat16)))
    wh = jnp.stack(wh)                                        # (L-1, 128, 128) bf16

    bs = []
    for _, b in params:
        out_f = b.shape[0]
        bs.append(jnp.zeros((LANE,), jnp.float32).at[:out_f].set(b))
    biases = jnp.stack(bs)                                    # (L, 128) f32
    return w0_p, wh, biases


# ----------------------------- Batch tiling -----------------------------

def _choose_batch_tile(batch, batch_block, min_grid):
    """Pick a batch tile bb (multiple of 16 for bf16 sublane packing, <= batch_block).

    Prefers a multiple-of-16 divisor of the rounded-up batch so the last tile has
    no dead rows; falls back to a full-size tile (accepting a partial last tile)
    when only tiny divisors exist.  min_grid > 1 caps the tile so the "parallel"
    batch axis can shard across multiple TensorCores (v7x).
    """
    b16 = _round_up(batch, 16)
    cap = max(16, (min(batch_block, b16 // max(min_grid, 1)) // 16) * 16)
    bb = max(d for d in range(16, cap + 1, 16) if b16 % d == 0)
    if 2 * bb < cap:          # only tiny exact divisors -> amortize grid-step overhead instead
        bb = cap
    return bb, _round_up(b16, bb)


# ----------------------------- Fused forward -----------------------------

@functools.partial(jax.jit, static_argnames=("out_features", "batch_block", "min_grid"))
def net_forward(x, w0, wh, biases, *, out_features, batch_block=512, min_grid=1):
    """Single fused pallas_call implementing the whole Net_He forward pass.

    Tuning: v5e/v6e (1 TC, 128 MiB VMEM) -> batch_block 512-2048, min_grid=1.
            v7x (2 TCs, 64 MiB VMEM)     -> batch_block 512-1024, min_grid=2+.
    """
    num_layers = biases.shape[0]
    batch, in_f = x.shape
    out_pad = w0.shape[1]
    assert w0.shape[0] == in_f
    assert wh.shape == (num_layers - 1, out_pad, out_pad)

    bb, b_pad = _choose_batch_tile(batch, batch_block, min_grid)

    x_in = x.astype(jnp.bfloat16)                     # halve HBM bytes for the dominant stream
    if b_pad != batch:
        x_in = jnp.pad(x_in, ((0, b_pad - batch), (0, 0)))

    grid = (b_pad // bb,)
    kernel = functools.partial(_fused_mlp_kernel, num_layers=num_layers)

    out_full = pl.pallas_call(
        kernel,
        out_shape=jax.ShapeDtypeStruct((b_pad, out_pad), jnp.float32),
        grid=grid,
        in_specs=[
            pl.BlockSpec((bb, in_f), lambda i: (i, 0)),       # x: natural 784 last dim
            pl.BlockSpec(w0.shape, lambda i: (0, 0)),         # grid-invariant, VMEM-resident
            pl.BlockSpec(wh.shape, lambda i: (0, 0, 0)),
            pl.BlockSpec(biases.shape, lambda i: (0, 0)),
        ],
        out_specs=pl.BlockSpec((bb, out_pad), lambda i: (i, 0)),
        compiler_params=pltpu.CompilerParams(
            dimension_semantics=("parallel",),                # batch axis: TC-splittable
            vmem_limit_bytes=32 << 20,
        ),
    )(x_in, w0, wh, biases)

    # Slice back to real batch rows and the real 10 output features.
    return out_full[:batch, :out_features]


# ----------------------------- Reference -----------------------------

def reference_forward(x, params, compute_dtype=jnp.float32):
    """Pure-JAX reference using the same dtype recipe as the kernel."""
    h = x.astype(compute_dtype)
    num_layers = len(params)
    for l, (w, b) in enumerate(params):
        acc = jnp.dot(h, w.astype(compute_dtype), preferred_element_type=jnp.float32) + b
        if l < num_layers - 1:
            acc = jnp.maximum(acc, 0.0)
            h = acc.astype(compute_dtype)
        else:
            h = acc
    return h


# ----------------------------- Driver -----------------------------

if __name__ == "__main__":
    key = jax.random.PRNGKey(0)
    key, xk = jax.random.split(key)

    batch = 8
    x = jax.random.normal(xk, (batch, LAYERS[0]), jnp.float32)  # flattened 28x28 "images"

    params = init_params(key, LAYERS)          # unpadded f32 reference params
    w0, wh, biases = pack_params(params)       # packed, lane-dense, bf16 kernel params

    out = net_forward(x, w0, wh, biases, out_features=LAYERS[-1])
    out = jax.block_until_ready(out)
    assert out.shape == (batch, LAYERS[-1])
    assert out.dtype == jnp.float32

    # Compare against a pure-JAX reference using the same bf16-weights / f32-accum
    # recipe (bf16 storage makes an exact comparison to the pure-f32 model moot).
    ref = reference_forward(x, params, compute_dtype=jnp.bfloat16)
    assert jnp.allclose(out, ref, atol=2e-2, rtol=2e-2), float(jnp.max(jnp.abs(out - ref)))

    print("KERNEL_OK")
</pallas_src>

<mosaic_0001>
module attributes {stable_mosaic.version = 11 : i64} {
  func.func @_fused_mlp_kernel(%arg0: i32, %arg1: memref<16x784xbf16, #tpu.memory_space<vmem>>, %arg2: memref<784x128xbf16, #tpu.memory_space<vmem>>, %arg3: memref<5x128x128xbf16, #tpu.memory_space<vmem>>, %arg4: memref<6x128xf32, #tpu.memory_space<vmem>>, %arg5: memref<16x128xf32, #tpu.memory_space<vmem>>) attributes {dimension_semantics = [#tpu.dimension_semantics<parallel>], iteration_bounds = array<i64: 1>, scalar_prefetch = 0 : i64, scratch_operands = 0 : i64, tpu.core_type = #tpu.core_type<tc>, window_params = [{transform_indices = @transform_0, window_bounds = array<i64: 16, 784>}, {pipeline_mode = #tpu.pipeline_mode<synchronous>, transform_indices = @transform_1, window_bounds = array<i64: 784, 128>}, {pipeline_mode = #tpu.pipeline_mode<synchronous>, transform_indices = @transform_2, window_bounds = array<i64: 5, 128, 128>}, {pipeline_mode = #tpu.pipeline_mode<synchronous>, transform_indices = @transform_3, window_bounds = array<i64: 6, 128>}, {transform_indices = @transform_4, window_bounds = array<i64: 16, 128>}]} {
    %c0 = arith.constant 0 : index
    %c0_0 = arith.constant 0 : index
    %0 = vector.load %arg1[%c0, %c0_0] : memref<16x784xbf16, #tpu.memory_space<vmem>>, vector<16x784xbf16>
    %c0_1 = arith.constant 0 : index
    %c0_2 = arith.constant 0 : index
    %1 = vector.load %arg2[%c0_1, %c0_2] : memref<784x128xbf16, #tpu.memory_space<vmem>>, vector<784x128xbf16>
    %cst = arith.constant dense<0.000000e+00> : vector<16x128xf32>
    %2 = tpu.matmul %0, %1, %cst {dimension_numbers = #tpu.dot_dimension_numbers<[1], [0], [0], [1], [0, 0, 1, 1], [], []>} : vector<16x784xbf16>, vector<784x128xbf16>, vector<16x128xf32> -> vector<16x128xf32>
    %c0_3 = arith.constant 0 : index
    %c0_4 = arith.constant 0 : index
    %3 = vector.load %arg4[%c0_3, %c0_4] : memref<6x128xf32, #tpu.memory_space<vmem>>, vector<1x128xf32>
    %4 = vector.broadcast %3 : vector<1x128xf32> to vector<16x128xf32>
    %5 = arith.addf %2, %4 : vector<16x128xf32>
    %cst_5 = arith.constant 0.000000e+00 : f32
    %6 = vector.broadcast %cst_5 : f32 to vector<16x128xf32>
    %7 = arith.maximumf %5, %6 : vector<16x128xf32>
    %8 = arith.truncf %7 : vector<16x128xf32> to vector<16x128xbf16>
    %c0_6 = arith.constant 0 : index
    %c0_7 = arith.constant 0 : index
    %c0_8 = arith.constant 0 : index
    %9 = vector.load %arg3[%c0_6, %c0_7, %c0_8] : memref<5x128x128xbf16, #tpu.memory_space<vmem>>, vector<1x128x128xbf16>
    %10 = vector.shape_cast %9 : vector<1x128x128xbf16> to vector<128x128xbf16>
    %cst_9 = arith.constant dense<0.000000e+00> : vector<16x128xf32>
    %11 = tpu.matmul %8, %10, %cst_9 {dimension_numbers = #tpu.dot_dimension_numbers<[1], [0], [0], [1], [0, 0, 1, 1], [], []>} : vector<16x128xbf16>, vector<128x128xbf16>, vector<16x128xf32> -> vector<16x128xf32>
    %c1 = arith.constant 1 : index
    %c0_10 = arith.constant 0 : index
    %12 = vector.load %arg4[%c1, %c0_10] : memref<6x128xf32, #tpu.memory_space<vmem>>, vector<1x128xf32>
    %13 = vector.broadcast %12 : vector<1x128xf32> to vector<16x128xf32>
    %14 = arith.addf %11, %13 : vector<16x128xf32>
    %cst_11 = arith.constant 0.000000e+00 : f32
    %15 = vector.broadcast %cst_11 : f32 to vector<16x128xf32>
    %16 = arith.maximumf %14, %15 : vector<16x128xf32>
    %17 = arith.truncf %16 : vector<16x128xf32> to vector<16x128xbf16>
    %c1_12 = arith.constant 1 : index
    %c0_13 = arith.constant 0 : index
    %c0_14 = arith.constant 0 : index
    %18 = vector.load %arg3[%c1_12, %c0_13, %c0_14] : memref<5x128x128xbf16, #tpu.memory_space<vmem>>, vector<1x128x128xbf16>
    %19 = vector.shape_cast %18 : vector<1x128x128xbf16> to vector<128x128xbf16>
    %cst_15 = arith.constant dense<0.000000e+00> : vector<16x128xf32>
    %20 = tpu.matmul %17, %19, %cst_15 {dimension_numbers = #tpu.dot_dimension_numbers<[1], [0], [0], [1], [0, 0, 1, 1], [], []>} : vector<16x128xbf16>, vector<128x128xbf16>, vector<16x128xf32> -> vector<16x128xf32>
    %c2 = arith.constant 2 : index
    %c0_16 = arith.constant 0 : index
    %21 = vector.load %arg4[%c2, %c0_16] : memref<6x128xf32, #tpu.memory_space<vmem>>, vector<1x128xf32>
    %22 = vector.broadcast %21 : vector<1x128xf32> to vector<16x128xf32>
    %23 = arith.addf %20, %22 : vector<16x128xf32>
    %cst_17 = arith.constant 0.000000e+00 : f32
    %24 = vector.broadcast %cst_17 : f32 to vector<16x128xf32>
    %25 = arith.maximumf %23, %24 : vector<16x128xf32>
    %26 = arith.truncf %25 : vector<16x128xf32> to vector<16x128xbf16>
    %c2_18 = arith.constant 2 : index
    %c0_19 = arith.constant 0 : index
    %c0_20 = arith.constant 0 : index
    %27 = vector.load %arg3[%c2_18, %c0_19, %c0_20] : memref<5x128x128xbf16, #tpu.memory_space<vmem>>, vector<1x128x128xbf16>
    %28 = vector.shape_cast %27 : vector<1x128x128xbf16> to vector<128x128xbf16>
    %cst_21 = arith.constant dense<0.000000e+00> : vector<16x128xf32>
    %29 = tpu.matmul %26, %28, %cst_21 {dimension_numbers = #tpu.dot_dimension_numbers<[1], [0], [0], [1], [0, 0, 1, 1], [], []>} : vector<16x128xbf16>, vector<128x128xbf16>, vector<16x128xf32> -> vector<16x128xf32>
    %c3 = arith.constant 3 : index
    %c0_22 = arith.constant 0 : index
    %30 = vector.load %arg4[%c3, %c0_22] : memref<6x128xf32, #tpu.memory_space<vmem>>, vector<1x128xf32>
    %31 = vector.broadcast %30 : vector<1x128xf32> to vector<16x128xf32>
    %32 = arith.addf %29, %31 : vector<16x128xf32>
    %cst_23 = arith.constant 0.000000e+00 : f32
    %33 = vector.broadcast %cst_23 : f32 to vector<16x128xf32>
    %34 = arith.maximumf %32, %33 : vector<16x128xf32>
    %35 = arith.truncf %34 : vector<16x128xf32> to vector<16x128xbf16>
    %c3_24 = arith.constant 3 : index
    %c0_25 = arith.constant 0 : index
    %c0_26 = arith.constant 0 : index
    %36 = vector.load %arg3[%c3_24, %c0_25, %c0_26] : memref<5x128x128xbf16, #tpu.memory_space<vmem>>, vector<1x128x128xbf16>
    %37 = vector.shape_cast %36 : vector<1x128x128xbf16> to vector<128x128xbf16>
    %cst_27 = arith.constant dense<0.000000e+00> : vector<16x128xf32>
    %38 = tpu.matmul %35, %37, %cst_27 {dimension_numbers = #tpu.dot_dimension_numbers<[1], [0], [0], [1], [0, 0, 1, 1], [], []>} : vector<16x128xbf16>, vector<128x128xbf16>, vector<16x128xf32> -> vector<16x128xf32>
    %c4 = arith.constant 4 : index
    %c0_28 = arith.constant 0 : index
    %39 = vector.load %arg4[%c4, %c0_28] : memref<6x128xf32, #tpu.memory_space<vmem>>, vector<1x128xf32>
    %40 = vector.broadcast %39 : vector<1x128xf32> to vector<16x128xf32>
    %41 = arith.addf %38, %40 : vector<16x128xf32>
    %cst_29 = arith.constant 0.000000e+00 : f32
    %42 = vector.broadcast %cst_29 : f32 to vector<16x128xf32>
    %43 = arith.maximumf %41, %42 : vector<16x128xf32>
    %44 = arith.truncf %43 : vector<16x128xf32> to vector<16x128xbf16>
    %c4_30 = arith.constant 4 : index
    %c0_31 = arith.constant 0 : index
    %c0_32 = arith.constant 0 : index
    %45 = vector.load %arg3[%c4_30, %c0_31, %c0_32] : memref<5x128x128xbf16, #tpu.memory_space<vmem>>, vector<1x128x128xbf16>
    %46 = vector.shape_cast %45 : vector<1x128x128xbf16> to vector<128x128xbf16>
    %cst_33 = arith.constant dense<0.000000e+00> : vector<16x128xf32>
    %47 = tpu.matmul %44, %46, %cst_33 {dimension_numbers = #tpu.dot_dimension_numbers<[1], [0], [0], [1], [0, 0, 1, 1], [], []>} : vector<16x128xbf16>, vector<128x128xbf16>, vector<16x128xf32> -> vector<16x128xf32>
    %c5 = arith.constant 5 : index
    %c0_34 = arith.constant 0 : index
    %48 = vector.load %arg4[%c5, %c0_34] : memref<6x128xf32, #tpu.memory_space<vmem>>, vector<1x128xf32>
    %49 = vector.broadcast %48 : vector<1x128xf32> to vector<16x128xf32>
    %50 = arith.addf %47, %49 : vector<16x128xf32>
    %c0_35 = arith.constant 0 : index
    %c0_36 = arith.constant 0 : index
    %51 = vector.load %arg5[%c0_35, %c0_36] : memref<16x128xf32, #tpu.memory_space<vmem>>, vector<16x128xf32>
    tpu.vector_store %arg5[%c0_35, %c0_36], %50 {strides = array<i32>} : memref<16x128xf32, #tpu.memory_space<vmem>>, vector<16x128xf32>,
    return
  }
  func.func @transform_0(%arg0: i32) -> (i32, i32) {
    %c0_i32 = arith.constant 0 : i32
    %c0_i32_0 = arith.constant 0 : i32
    return %arg0, %c0_i32 : i32, i32
  }
  func.func @transform_1(%arg0: i32) -> (i32, i32) {
    %c0_i32 = arith.constant 0 : i32
    %c0_i32_0 = arith.constant 0 : i32
    %c0_i32_1 = arith.constant 0 : i32
    return %c0_i32, %c0_i32_0 : i32, i32
  }
  func.func @transform_2(%arg0: i32) -> (i32, i32, i32) {
    %c0_i32 = arith.constant 0 : i32
    %c0_i32_0 = arith.constant 0 : i32
    %c0_i32_1 = arith.constant 0 : i32
    %c0_i32_2 = arith.constant 0 : i32
    return %c0_i32, %c0_i32_0, %c0_i32_1 : i32, i32, i32
  }
  func.func @transform_3(%arg0: i32) -> (i32, i32) {
    %c0_i32 = arith.constant 0 : i32
    %c0_i32_0 = arith.constant 0 : i32
    %c0_i32_1 = arith.constant 0 : i32
    return %c0_i32, %c0_i32_0 : i32, i32
  }
  func.func @transform_4(%arg0: i32) -> (i32, i32) {
    %c0_i32 = arith.constant 0 : i32
    %c0_i32_0 = arith.constant 0 : i32
    return %arg0, %c0_i32 : i32, i32
  }
}

</mosaic_0001>

<bundles_post_ra>
// kernel: net_forward.1
= control target key start
LH: loop header
LB: loop body
LE: loop exit
PB: predicated region body
PF: predicated region fallthrough
CT: control target
= control target key end

     0   :  { %9 = vsyncpa [#allocation3], 0  ;;  %s1859_s0 = inlined_call_operand.vmem [shape: bf16[16,784], index: 0, kind: input, shape index: {}]   ;;  %s1860_s1 = inlined_call_operand.hbm [shape: bf16[784,128], index: 1, kind: input, shape index: {}]   ;;  %s1861_s2 = inlined_call_operand.hbm [shape: bf16[5,128,128], index: 2, kind: input, shape index: {}]   ;;  %s1862_s3 = inlined_call_operand.vmem [shape: f32[6,128], index: 3, kind: input, shape index: {}]   ;;  %s1863_s4 = inlined_call_operand.vmem [shape: f32[16,128], index: 4, kind: output, shape index: {}]  }
   0x1   :  { %10 = vsyncpa [#allocation5], 0  ;;  %s1706_s15 = smov [#allocation2]   ;;  %s1658_s19 = scalar_lea.hbm %s1860_s1, 6272 }
   0x2   :  { %s18_s16 = sshll.u32 %s1706_s15, 4  ;;  %p1659_p0 = scmp.ne.s32.totalorder %s1860_s1, %s1658_s19  ;;  %s19_s16 = int_to_ptr.vmem [resolvable:$true] %s18_s16 }
   0x3   :  { %p1662_p1 = scmp.lt.u32.totalorder %s1658_s19, %s1860_s1 }
   0x5   :  { %p1664_p2 = pnand %p1662_p1, %p1659_p0 }
   0x7   :  { %1667 = shalt.err (!%p1664_p2)
}
   0x8   :  { %s1668_s24 = scalar_lea.vmem %s19_s16, 6272  ;;  %p1673_p4 = scmp.lt.s32.totalorder %s19_s16, %s19_s16 }
   0x9   :  { %p1669_p3 = scmp.ne.s32.totalorder %s19_s16, %s1668_s24  ;;  %p1674_p5 = scmp.lt.s32.totalorder %s1668_s24, %s1668_s24 }
   0xb   :  { %p1675_p6 = por %p1674_p5, %p1673_p4 }
   0xd   :  { %p1676_p7 = pnand %p1675_p6, %p1669_p3 }
   0xf   :  { %1679 = shalt.err (!%p1676_p7)
}
  0x10   :  { %s1707_s25 = smov 64   ;;  %s1708_s26 = smov 4  }
  0x11   :  { %24 = dma.hbm_to_vmem [thread:$0]  %s1860_s1, 6272, %s19_s16, [#allocation3], %s1707_s25, %s1707_s25, %s1708_s26  }
  0x12   :  { %s1709_s29 = smov [#allocation4]   ;;  %s1680_s7 = scalar_lea.hbm %s1861_s2, 5120 }
  0x13   :  { %s30_s30 = sshll.u32 %s1709_s29, 4  ;;  %p1681_p8 = scmp.ne.s32.totalorder %s1861_s2, %s1680_s7  ;;  %s31_s30 = int_to_ptr.vmem [resolvable:$true] %s30_s30 }
  0x14   :  { %p1684_p9 = scmp.lt.u32.totalorder %s1680_s7, %s1861_s2 }
  0x16   :  { %p1686_p10 = pnand %p1684_p9, %p1681_p8 }
  0x18   :  { %1689 = shalt.err (!%p1686_p10)
}
  0x19   :  { %s1690_s12 = scalar_lea.vmem %s31_s30, 5120  ;;  %p1695_p12 = scmp.lt.s32.totalorder %s31_s30, %s31_s30 }
  0x1a   :  { %p1691_p11 = scmp.ne.s32.totalorder %s31_s30, %s1690_s12  ;;  %p1696_p13 = scmp.lt.s32.totalorder %s1690_s12, %s1690_s12 }
  0x1c   :  { %p1697_p0 = por %p1696_p13, %p1695_p12 }
  0x1e   :  { %p1698_p1 = pnand %p1697_p0, %p1691_p11 }
  0x20   :  { %1701 = shalt.err (!%p1698_p1)
}
  0x21   :  { %36 = dma.hbm_to_vmem [thread:$0]  %s1861_s2, 5120, %s31_s30, [#allocation5], %s1707_s25, %s1707_s25, %s1708_s26  }
  0x22   :  { %1702 = dma.done.wait [#allocation3], 6272  }
  0x23   :  { %1703 = vsyncadd [#allocation3], 4294961024 }
  0x24   :  { %1704 = dma.done.wait [#allocation5], 5120  }
  0x25   :  { %1705 = vsyncadd [#allocation5], 4294962176  ;;  %v1559_v0 = vld [vmem:[#allocation2 + $0x40] sm:$0xff]   ;;  %v1563_v4 = vld [vmem:[#allocation2 + $0x48] sm:$0xff]   ;;  %v1710_v38 = vmov 0.0   ;;  %vm1711_vm0 = vmmov 0  }
  0x26   :  { %v1560_v1 = vld [vmem:[#allocation2] sm:$0xff]   ;;  %1334 = vmatprep.subr.bf16.mxu0 %v1559_v0  ;;  %v1564_v5 = vld [vmem:[#allocation2 + $0x8] sm:$0xff]   ;;  %v1567_v8 = vld [vmem:[#allocation2 + $0x50] sm:$0xff]   ;;  %vm486_vm1 = vcmask 130048  }
  0x27   :  { %v1561_v2 = vld [vmem:[#allocation2 + $0xc0] sm:$0xff]   ;;  %1335 = vmatpush3.bf16.msra.mxu0 %v1560_v1  ;;  %v1565_v6 = vld [vmem:[#allocation2 + $0xc8] sm:$0xff]   ;;  %v1568_v9 = vld [vmem:[#allocation2 + $0x10] sm:$0xff]  }
  0x28   :  { %v1562_v3 = vld [vmem:[#allocation2 + $0x80] sm:$0xff]   ;;  %1356 = vmatprep.subr.bf16.mxu1 %v1561_v2  ;;  %1336 = vmatprep.subr.bf16.mxu0 %v1563_v4  ;;  %v1566_v7 = vld [vmem:[#allocation2 + $0x88] sm:$0xff]   ;;  %v1569_v10 = vld [vmem:[#allocation2 + $0xd0] sm:$0xff]  }
  0x29   :  { %1357 = vmatpush3.bf16.msra.mxu1 %v1562_v3  ;;  %v1570_v11 = vld [vmem:[#allocation2 + $0x90] sm:$0xff]   ;;  %v1571_v12 = vld [vmem:[#allocation2 + $0x58] sm:$0xff]   ;;  %v1575_v16 = vld [vmem:[#allocation2 + $0x60] sm:$0xff]  }
  0x2a   :  { %1358 = vmatprep.subr.bf16.mxu1 %v1565_v6  ;;  %v1572_v13 = vld [vmem:[#allocation2 + $0x18] sm:$0xff]   ;;  %v1576_v17 = vld [vmem:[#allocation2 + $0x20] sm:$0xff]   ;;  %v1579_v20 = vld [vmem:[#allocation2 + $0x68] sm:$0xff]  }
  0x2b   :  { %1337 = vmatpush3.bf16.msra.mxu0 %v1564_v5  ;;  %v1573_v14 = vld [vmem:[#allocation2 + $0xd8] sm:$0xff]   ;;  %v1577_v18 = vld [vmem:[#allocation2 + $0xe0] sm:$0xff]   ;;  %v1580_v21 = vld [vmem:[#allocation2 + $0x28] sm:$0xff]  }
  0x2c   :  { %1338 = vmatprep.subr.bf16.mxu0 %v1567_v8  ;;  %v1574_v15 = vld [vmem:[#allocation2 + $0x98] sm:$0xff]   ;;  %v1578_v19 = vld [vmem:[#allocation2 + $0xa0] sm:$0xff]   ;;  %v1581_v22 = vld [vmem:[#allocation2 + $0xe8] sm:$0xff]  }
  0x2d   :  { %1359 = vmatpush3.bf16.msra.mxu1 %v1566_v7  ;;  %v1582_v23 = vld [vmem:[#allocation2 + $0xa8] sm:$0xff]   ;;  %v1583_v24 = vld [vmem:[#allocation2 + $0x70] sm:$0xff]   ;;  %v1587_v28 = vld [vmem:[#allocation2 + $0x78] sm:$0xff]  }
  0x2e   :  { %1360 = vmatprep.subr.bf16.mxu1 %v1569_v10  ;;  %v1584_v25 = vld [vmem:[#allocation2 + $0x30] sm:$0xff]   ;;  %v1588_v29 = vld [vmem:[#allocation2 + $0x38] sm:$0xff]   ;;  %v1592_v32 = vld [vmem:[%s1859_s0 + $0x4] ss:$28 sps:$4 sm:$0xff]  }
  0x2f   :  { %1339 = vmatpush3.bf16.msra.mxu0 %v1568_v9  ;;  %v1585_v26 = vld [vmem:[#allocation2 + $0xf0] sm:$0xff]   ;;  %v1589_v30 = vld [vmem:[#allocation2 + $0xf8] sm:$0xff]   ;;  %522 = vmatprep.mubr.bf16.mxu0 %v1592_v32  ;;  %v1594_v34 = vld [vmem:[#allocation2 + $0x140] sm:$0xff]  }
  0x30   :  { %1340 = vmatprep.subr.bf16.mxu0 %v1571_v12  ;;  %v1586_v27 = vld [vmem:[#allocation2 + $0xb0] sm:$0xff]   ;;  %v1590_v31 = vld [vmem:[%s1859_s0] ss:$28 sps:$4 sm:$0xff]   ;;  %v1595_v35 = vld [vmem:[%s1859_s0 + $0x8] ss:$28 sps:$4 sm:$0xff]  }
  0x31   :  { %1361 = vmatpush3.bf16.msra.mxu1 %v1570_v11  ;;  %v1593_v33 = vld [vmem:[#allocation2 + $0xb8] sm:$0xff]   ;;  %v1597_v36 = vld [vmem:[%s1859_s0 + $0xc] ss:$28 sps:$4 sm:$0xff]   ;;  %v1598_v37 = vld [vmem:[#allocation2 + $0x100] sm:$0xff]  }
  0x32   :  { %1362 = vmatprep.subr.bf16.mxu1 %v1573_v14  ;;  %563 = vmatprep.mubr.bf16.mxu1 %v1597_v36  ;;  %v1599_v39 = vld [vmem:[#allocation2 + $0x148] sm:$0xff]   ;;  %v1601_v41 = vld [vmem:[#allocation2 + $0x150] sm:$0xff]   ;;  %v1603_v43 = vld [vmem:[#allocation2 + $0x158] sm:$0xff]  }
  0x33   :  { %1341 = vmatpush3.bf16.msra.mxu0 %v1572_v13  ;;  %v1600_v40 = vld [vmem:[#allocation2 + $0x108] sm:$0xff]   ;;  %v1602_v42 = vld [vmem:[#allocation2 + $0x110] sm:$0xff]   ;;  %v1604_v44 = vld [vmem:[#allocation2 + $0x118] sm:$0xff]  }
  0x34   :  { %1342 = vmatprep.subr.bf16.mxu0 %v1575_v16  ;;  %v1605_v45 = vld [vmem:[#allocation2 + $0x160] sm:$0xff]   ;;  %v1607_v47 = vld [vmem:[#allocation2 + $0x168] sm:$0xff]   ;;  %v1616_v50 = vld [vmem:[%s1859_s0 + $0x14] ss:$28 sps:$4 sm:$0xff]  }
  0x35   :  { %1363 = vmatpush3.bf16.msra.mxu1 %v1574_v15  ;;  %v1606_v46 = vld [vmem:[#allocation2 + $0x120] sm:$0xff]   ;;  %v1608_v49 = vld [vmem:[#allocation2 + $0x128] sm:$0xff]   ;;  %v1609_v51 = vld [vmem:[#allocation2 + $0x170] sm:$0xff]  }
  0x36   :  { %1364 = vmatprep.subr.bf16.mxu1 %v1577_v18  ;;  %v1613_v48 = vld [vmem:[#allocation2 + $0x180] sm:$0xff]   ;;  %v1617_v52 = vld [vmem:[%s1859_s0 + $0x18] ss:$28 sps:$4 sm:$0xff]   ;;  %v1614_v56 = vld [vmem:[%s1859_s0 + $0x10] ss:$28 sps:$4 sm:$0xff]  }
  0x37   :  { %1343 = vmatpush3.bf16.msra.mxu0 %v1576_v17  ;;  %v1610_v53 = vld [vmem:[#allocation2 + $0x130] sm:$0xff]   ;;  %v1611_v54 = vld [vmem:[#allocation2 + $0x178] sm:$0xff]   ;;  %v1618_v57 = vld [vmem:[#allocation4] sm:$0xff]  }
  0x38   :  { %1344 = vmatprep.subr.bf16.mxu0 %v1579_v20  ;;  %v1612_v55 = vld [vmem:[#allocation2 + $0x138] sm:$0xff]   ;;  %v1619_v58 = vld [vmem:[#allocation4 + $0x8] sm:$0xff]   ;;  %v1621_v60 = vld [vmem:[#allocation4 + $0x18] sm:$0xff]  }
  0x39   :  { %1365 = vmatpush3.bf16.msra.mxu1 %v1578_v19  ;;  %v1620_v59 = vld [vmem:[#allocation4 + $0x10] sm:$0xff]   ;;  %v1622_v61 = vld [vmem:[#allocation4 + $0x20] sm:$0xff]   ;;  %v1623_v62 = vld [vmem:[#allocation4 + $0x28] sm:$0xff]  }
  0x3a   :  { %1366 = vmatprep.subr.bf16.mxu1 %v1581_v22  ;;  %v1624_v63 = vld [vmem:[#allocation4 + $0x30] sm:$0xff]   ;;  %v1625_v0 = vld [vmem:[#allocation4 + $0x38] sm:$0xff]   ;;  %v1626_v1 = vld [vmem:[#allocation4 + $0x40] sm:$0xff]  }
  0x3b   :  { %1345 = vmatpush3.bf16.msra.mxu0 %v1580_v21  ;;  %v1627_v2 = vld [vmem:[#allocation4 + $0x48] sm:$0xff]   ;;  %v1628_v3 = vld [vmem:[#allocation4 + $0x50] sm:$0xff]   ;;  %v1629_v4 = vld [vmem:[#allocation4 + $0x58] sm:$0xff]  }
  0x3c   :  { %1346 = vmatprep.subr.bf16.mxu0 %v1583_v24  ;;  %v1630_v5 = vld [vmem:[#allocation4 + $0x60] sm:$0xff]   ;;  %v1631_v6 = vld [vmem:[#allocation4 + $0x68] sm:$0xff]   ;;  %v1231_v8 = vld [vmem:[%s1862_s3] ss:$0 sm:$0xff] }
  0x3d   :  { %1367 = vmatpush3.bf16.msra.mxu1 %v1582_v23 }
  0x3e   :  { %1368 = vmatprep.subr.bf16.mxu1 %v1585_v26 }
  0x3f   :  { %1347 = vmatpush3.bf16.msra.mxu0 %v1584_v25 }
  0x40   :  { %1348 = vmatprep.subr.bf16.mxu0 %v1587_v28 }
  0x41   :  { %1369 = vmatpush3.bf16.msra.mxu1 %v1586_v27 }
  0x42   :  { %1370 = vmatprep.subr.bf16.mxu1 %v1589_v30 }
  0x43   :  { %1349 = vmatpush3.bf16.msra.mxu0 %v1588_v29 }
  0x44   :  { %1378 = vmatprep.subr.bf16.mxu0 %v1594_v34 }
  0x45   :  { %1371 = vmatpush3.bf16.msra.mxu1 %v1593_v33 }
  0x46   :  { %523 = vmatmul.mubr.bf16.vlgmr.msra.gmra.mrb[0].mxu0 %v1590_v31  ;;  %1447 = vmatprep.subr.bf16.mxu1 %v1710_v38 }
  0x47   :  { %1379 = vmatpush3.bf16.msra.mxu0 %v1598_v37  ;;  %604 = vmatprep.mubr.bf16.mxu0 %v1616_v50  ;;  %v1289_v50 = vld [vmem:[%s1862_s3 + $0x1] ss:$0 sm:$0xff] }
  0x48   :  { %564 = vmatmul.mubr.bf16.vlgmr.msra.gmra.mrb[0].mxu1 %v1595_v35  ;;  %1380 = vmatprep.subr.bf16.mxu0 %v1599_v39 }
  0x49   :  { %1449 = vmatprep.mubr.msk.bf16.mxu1 %vm1711_vm0, %v1710_v38  ;;  %1448 = vmatpush3.bf16.msra.mxu1 %v1613_v48  ;;  %v1638_v48 = vld [vmem:[#allocation4 + $0xa0] sm:$0xff]  }
  0x4a   :  { %1453 = vmatprep.subr.bf16.mxu1 %v1710_v38 }
  0x4b   :  { %1381 = vmatpush3.bf16.msra.mxu0 %v1600_v40 }
  0x4c   :  { %1382 = vmatprep.subr.bf16.mxu0 %v1601_v41 }
  0x4f   :  { %1383 = vmatpush3.bf16.msra.mxu0 %v1602_v42  ;;  %v1632_v42 = vld [vmem:[#allocation4 + $0x70] sm:$0xff]  }
  0x50   :  { %1384 = vmatprep.subr.bf16.mxu0 %v1603_v43  ;;  %1450 = vmatmul.mubr.msk.bf16.vlgmr.msra.gmra.mrb[4].mxu1 %vm486_vm1, %v1617_v52  ;;  %v1633_v43 = vld [vmem:[#allocation4 + $0x78] sm:$0xff]  }
  0x51   :  { %1469 = vmatprep.mubr.msk.bf16.mxu1 %vm1711_vm0, %v1710_v38  ;;  %1454 = vmatpush3.bf16.msra.mxu1 %v1618_v57 }
  0x52   :  { %1455 = vmatprep.subr.bf16.mxu1 %v1710_v38 }
  0x53   :  { %1385 = vmatpush3.bf16.msra.mxu0 %v1604_v44  ;;  %v1634_v44 = vld [vmem:[#allocation4 + $0x80] sm:$0xff]  }
  0x54   :  { %1386 = vmatprep.subr.bf16.mxu0 %v1605_v45  ;;  %v1635_v45 = vld [vmem:[#allocation4 + $0x88] sm:$0xff]  }
  0x55   :  { %1456 = vmatpush3.bf16.msra.mxu1 %v1619_v58 }
  0x56   :  { %1457 = vmatprep.subr.bf16.mxu1 %v1710_v38 }
  0x57   :  { %1387 = vmatpush3.bf16.msra.mxu0 %v1606_v46  ;;  %v1636_v46 = vld [vmem:[#allocation4 + $0x90] sm:$0xff]  }
  0x58   :  { %1388 = vmatprep.subr.bf16.mxu0 %v1607_v47  ;;  %v1637_v47 = vld [vmem:[#allocation4 + $0x98] sm:$0xff]  }
  0x59   :  { %1458 = vmatpush3.bf16.msra.mxu1 %v1620_v59 }
  0x5a   :  { %1459 = vmatprep.subr.bf16.mxu1 %v1710_v38 }
  0x5b   :  { %1389 = vmatpush3.bf16.msra.mxu0 %v1608_v49  ;;  %v1639_v49 = vld [vmem:[#allocation4 + $0xa8] sm:$0xff]  }
  0x5c   :  { %1390 = vmatprep.subr.bf16.mxu0 %v1609_v51 }
  0x5d   :  { %1460 = vmatpush3.bf16.msra.mxu1 %v1621_v60  ;;  %v1640_v60 = vld [vmem:[#allocation4 + $0xb0] sm:$0xff]  }
  0x5e   :  { %1461 = vmatprep.subr.bf16.mxu1 %v1710_v38 }
  0x5f   :  { %1391 = vmatpush3.bf16.msra.mxu0 %v1610_v53 }
  0x60   :  { %1392 = vmatprep.subr.bf16.mxu0 %v1611_v54 }
  0x61   :  { %1462 = vmatpush3.bf16.msra.mxu1 %v1622_v61  ;;  %v1641_v61 = vld [vmem:[#allocation4 + $0xb8] sm:$0xff]  }
  0x62   :  { %1463 = vmatprep.subr.bf16.mxu1 %v1710_v38 }
  0x63   :  { %1393 = vmatpush3.bf16.msra.mxu0 %v1612_v55 }
  0x64   :  { %1473 = vmatprep.subr.bf16.mxu0 %v1710_v38 }
  0x65   :  { %1464 = vmatpush3.bf16.msra.mxu1 %v1623_v62  ;;  %v1642_v62 = vld [vmem:[#allocation4 + $0xc0] sm:$0xff]  }
  0x66   :  { %605 = vmatmul.mubr.bf16.vlgmr.msra.gmra.mrb[4].mxu0 %v1614_v56  ;;  %1465 = vmatprep.subr.bf16.mxu1 %v1710_v38 }
  0x67   :  { %1489 = vmatprep.mubr.msk.bf16.mxu0 %vm1711_vm0, %v1710_v38  ;;  %1474 = vmatpush3.bf16.msra.mxu0 %v1626_v1  ;;  %v1645_v1 = vld [vmem:[#allocation4 + $0xd8] sm:$0xff]  }
  0x68   :  { %1475 = vmatprep.subr.bf16.mxu0 %v1710_v38 }
  0x69   :  { %1466 = vmatpush3.bf16.msra.mxu1 %v1624_v63  ;;  %v1643_v63 = vld [vmem:[#allocation4 + $0xc8] sm:$0xff]  }
  0x6a   :  { %1467 = vmatprep.subr.bf16.mxu1 %v1710_v38 }
  0x6b   :  { %1476 = vmatpush3.bf16.msra.mxu0 %v1627_v2  ;;  %v1646_v2 = vld [vmem:[#allocation4 + $0xe0] sm:$0xff]  }
  0x6c   :  { %1477 = vmatprep.subr.bf16.mxu0 %v1710_v38 }
  0x6d   :  { %1468 = vmatpush3.bf16.msra.mxu1 %v1625_v0  ;;  %v1644_v0 = vld [vmem:[#allocation4 + $0xd0] sm:$0xff]  }
  0x6e   :  { %1493 = vmatprep.subr.bf16.mxu1 %v1710_v38 }
  0x6f   :  { %1478 = vmatpush3.bf16.msra.mxu0 %v1628_v3  ;;  %v1647_v3 = vld [vmem:[#allocation4 + $0xe8] sm:$0xff]  }
  0x70   :  { %1479 = vmatprep.subr.bf16.mxu0 %v1710_v38 }
  0x73   :  { %1480 = vmatpush3.bf16.msra.mxu0 %v1629_v4  ;;  %v1298_v4 = vld [vmem:[%s1862_s3 + $0x2] ss:$0 sm:$0xff] }
  0x74   :  { %1481 = vmatprep.subr.bf16.mxu0 %v1710_v38 }
  0x77   :  { %1482 = vmatpush3.bf16.msra.mxu0 %v1630_v5 }
  0x78   :  { %1483 = vmatprep.subr.bf16.mxu0 %v1710_v38 }
  0x7b   :  { %1484 = vmatpush3.bf16.msra.mxu0 %v1631_v6 }
  0x7c   :  { %1485 = vmatprep.subr.bf16.mxu0 %v1710_v38 }
  0x7f   :  { %1486 = vmatpush3.bf16.msra.mxu0 %v1632_v42 }
  0x80   :  { %1487 = vmatprep.subr.bf16.mxu0 %v1710_v38 }
  0x83   :  { %1488 = vmatpush3.bf16.msra.mxu0 %v1633_v43 }
  0x84   :  { %1513 = vmatprep.subr.bf16.mxu0 %v1710_v38 }
 0x119   :  { %v1350_v7 = vpop.f32.mrb[0].mxu0 }
 0x11a   :  { %v1351_v9 = vpop.f32.mrb[1].mxu0 }
 0x11b   :  { %v1352_v10 = vadd.f32 %v1351_v9, %v1350_v7  ;;  %v1353_v11 = vpop.f32.mrb[2].mxu0  ;;  %v1372_v12 = vpop.f32.mrb[0].mxu1 }
 0x11c   :  { %v1354_v13 = vpop.f32.mrb[3].mxu0  ;;  %v1373_v16 = vpop.f32.mrb[1].mxu1 }
 0x11d   :  { %v525_v14 = vadd.f32 %v1352_v10, %v1231_v8  ;;  %v1355_v15 = vadd.f32 %v1354_v13, %v1353_v11  ;;  %v1374_v17 = vadd.f32 %v1373_v16, %v1372_v12  ;;  %v1375_v18 = vpop.f32.mrb[2].mxu1  ;;  %v1650_v16 = vld [vmem:[#allocation4 + $0x100] sm:$0xff]  }
 0x11e   :  { %v1376_v20 = vpop.f32.mrb[3].mxu1 }
 0x11f   :  { %v528_v19 = vadd.f32 %v1355_v15, %v1231_v8  ;;  %v566_v21 = vadd.f32 %v1374_v17, %v525_v14  ;;  %v1377_v22 = vadd.f32 %v1376_v20, %v1375_v18  ;;  %v1648_v14 = vld [vmem:[#allocation4 + $0xf0] sm:$0xff]   ;;  %v1649_v15 = vld [vmem:[#allocation4 + $0xf8] sm:$0xff]   ;;  %v1651_v17 = vld [vmem:[#allocation4 + $0x108] sm:$0xff]  }
 0x120   :  { %v1652_v18 = vld [vmem:[#allocation4 + $0x110] sm:$0xff]   ;;  %v1654_v20 = vld [vmem:[#allocation4 + $0x120] sm:$0xff]  }
 0x121   :  { %v569_v23 = vadd.f32 %v1377_v22, %v528_v19  ;;  %v1653_v19 = vld [vmem:[#allocation4 + $0x118] sm:$0xff]  }
 0x122   :  { %v1307_v22 = vld [vmem:[%s1862_s3 + $0x3] ss:$0 sm:$0xff] }
 0x123   :  { %v647_v24 = vpop.f32.mrb[4].mxu1 }
 0x124   :  { %v1451_v25 = vpop.f32.mrb[5].mxu1 }
 0x125   :  { %v650_v26 = vpop.f32.mrb[6].mxu1 }
 0x126   :  { %v1452_v27 = vpop.f32.mrb[7].mxu1 }
 0x139   :  { %v1394_v28 = vpop.f32.mrb[4].mxu0 }
 0x13a   :  { %v1395_v29 = vpop.f32.mrb[5].mxu0 }
 0x13b   :  { %v1396_v30 = vadd.f32 %v1395_v29, %v1394_v28  ;;  %v1397_v31 = vpop.f32.mrb[6].mxu0 }
 0x13c   :  { %v1398_v32 = vpop.f32.mrb[7].mxu0 }
 0x13d   :  { %v607_v33 = vadd.f32 %v1396_v30, %v566_v21  ;;  %v1399_v34 = vadd.f32 %v1398_v32, %v1397_v31  ;;  %v1655_v21 = vld [vmem:[#allocation4 + $0x128] sm:$0xff]   ;;  %v1656_v32 = vld [vmem:[#allocation4 + $0x130] sm:$0xff]  }
 0x13f   :  { %v648_v35 = vadd.f32 %v647_v24, %v607_v33  ;;  %v610_v36 = vadd.f32 %v1399_v34, %v569_v23  ;;  %v1657_v33 = vld [vmem:[#allocation4 + $0x138] sm:$0xff]  }
 0x140   :  { %v1316_v34 = vld [vmem:[%s1862_s3 + $0x4] ss:$0 sm:$0xff] }
 0x141   :  { %v651_v37 = vadd.f32 %v650_v26, %v610_v36  ;;  %v654_v39 = vmax.f32 %v648_v35, 0.0 }
 0x143   :  { %v655_v40 = vmax.f32 %v651_v37, 0.0 }
 0x145   :  { %v656_v41 = vpack.c.bf16 %v655_v40, %v654_v39 }
 0x147   :  { %1470 = vmatmul.mubr.bf16.vlgmr.msra.gmra.mrb[8].mxu1 %v656_v41 }
 0x148   :  { %1509 = vmatprep.mubr.msk.bf16.mxu1 %vm1711_vm0, %v1710_v38  ;;  %1494 = vmatpush3.bf16.msra.mxu1 %v1634_v44 }
 0x149   :  { %1495 = vmatprep.subr.bf16.mxu1 %v1710_v38 }
 0x14c   :  { %1496 = vmatpush3.bf16.msra.mxu1 %v1635_v45 }
 0x14d   :  { %1497 = vmatprep.subr.bf16.mxu1 %v1710_v38 }
 0x150   :  { %1498 = vmatpush3.bf16.msra.mxu1 %v1636_v46 }
 0x151   :  { %1499 = vmatprep.subr.bf16.mxu1 %v1710_v38 }
 0x154   :  { %1500 = vmatpush3.bf16.msra.mxu1 %v1637_v47 }
 0x155   :  { %1501 = vmatprep.subr.bf16.mxu1 %v1710_v38 }
 0x158   :  { %1502 = vmatpush3.bf16.msra.mxu1 %v1638_v48 }
 0x159   :  { %1503 = vmatprep.subr.bf16.mxu1 %v1710_v38 }
 0x15c   :  { %1504 = vmatpush3.bf16.msra.mxu1 %v1639_v49 }
 0x15d   :  { %1505 = vmatprep.subr.bf16.mxu1 %v1710_v38 }
 0x160   :  { %1506 = vmatpush3.bf16.msra.mxu1 %v1640_v60 }
 0x161   :  { %1507 = vmatprep.subr.bf16.mxu1 %v1710_v38 }
 0x164   :  { %1508 = vmatpush3.bf16.msra.mxu1 %v1641_v61 }
 0x165   :  { %1533 = vmatprep.subr.bf16.mxu1 %v1710_v38 }
 0x21a   :  { %v760_v51 = vpop.f32.mrb[8].mxu1 }
 0x21b   :  { %v761_v52 = vadd.f32 %v1289_v50, %v760_v51  ;;  %v1471_v53 = vpop.f32.mrb[9].mxu1 }
 0x21c   :  { %v763_v54 = vpop.f32.mrb[10].mxu1 }
 0x21d   :  { %v764_v55 = vadd.f32 %v1289_v50, %v763_v54  ;;  %v1472_v56 = vpop.f32.mrb[11].mxu1  ;;  %v767_v57 = vmax.f32 %v761_v52, 0.0 }
 0x21f   :  { %v768_v58 = vmax.f32 %v764_v55, 0.0 }
 0x221   :  { %v769_v59 = vpack.c.bf16 %v768_v58, %v767_v57 }
 0x223   :  { %1490 = vmatmul.mubr.bf16.vlgmr.msra.gmra.mrb[8].mxu0 %v769_v59 }
 0x224   :  { %1529 = vmatprep.mubr.msk.bf16.mxu0 %vm1711_vm0, %v1710_v38  ;;  %1514 = vmatpush3.bf16.msra.mxu0 %v1642_v62 }
 0x225   :  { %1515 = vmatprep.subr.bf16.mxu0 %v1710_v38 }
 0x228   :  { %1516 = vmatpush3.bf16.msra.mxu0 %v1643_v63 }
 0x229   :  { %1517 = vmatprep.subr.bf16.mxu0 %v1710_v38 }
 0x22c   :  { %1518 = vmatpush3.bf16.msra.mxu0 %v1644_v0 }
 0x22d   :  { %1519 = vmatprep.subr.bf16.mxu0 %v1710_v38 }
 0x230   :  { %1520 = vmatpush3.bf16.msra.mxu0 %v1645_v1 }
 0x231   :  { %1521 = vmatprep.subr.bf16.mxu0 %v1710_v38 }
 0x234   :  { %1522 = vmatpush3.bf16.msra.mxu0 %v1646_v2 }
 0x235   :  { %1523 = vmatprep.subr.bf16.mxu0 %v1710_v38 }
 0x238   :  { %1524 = vmatpush3.bf16.msra.mxu0 %v1647_v3 }
 0x239   :  { %1525 = vmatprep.subr.bf16.mxu0 %v1710_v38 }
 0x23c   :  { %1526 = vmatpush3.bf16.msra.mxu0 %v1648_v14 }
 0x23d   :  { %1527 = vmatprep.subr.bf16.mxu0 %v1710_v38 }
 0x240   :  { %1528 = vmatpush3.bf16.msra.mxu0 %v1649_v15 }
 0x2f6   :  { %v874_v5 = vpop.f32.mrb[8].mxu0 }
 0x2f7   :  { %v875_v6 = vadd.f32 %v1298_v4, %v874_v5  ;;  %v1491_v7 = vpop.f32.mrb[9].mxu0 }
 0x2f8   :  { %v877_v8 = vpop.f32.mrb[10].mxu0 }
 0x2f9   :  { %v878_v9 = vadd.f32 %v1298_v4, %v877_v8  ;;  %v1492_v10 = vpop.f32.mrb[11].mxu0  ;;  %v881_v11 = vmax.f32 %v875_v6, 0.0 }
 0x2fb   :  { %v882_v12 = vmax.f32 %v878_v9, 0.0 }
 0x2fd   :  { %v883_v13 = vpack.c.bf16 %v882_v12, %v881_v11 }
 0x2ff   :  { %1510 = vmatmul.mubr.bf16.vlgmr.msra.gmra.mrb[12].mxu1 %v883_v13 }
 0x300   :  { %1549 = vmatprep.mubr.msk.bf16.mxu1 %vm1711_vm0, %v1710_v38  ;;  %1534 = vmatpush3.bf16.msra.mxu1 %v1650_v16 }
 0x301   :  { %1535 = vmatprep.subr.bf16.mxu1 %v1710_v38 }
 0x304   :  { %1536 = vmatpush3.bf16.msra.mxu1 %v1651_v17 }
 0x305   :  { %1537 = vmatprep.subr.bf16.mxu1 %v1710_v38 }
 0x308   :  { %1538 = vmatpush3.bf16.msra.mxu1 %v1652_v18 }
 0x309   :  { %1539 = vmatprep.subr.bf16.mxu1 %v1710_v38 }
 0x30c   :  { %1540 = vmatpush3.bf16.msra.mxu1 %v1653_v19 }
 0x30d   :  { %1541 = vmatprep.subr.bf16.mxu1 %v1710_v38 }
 0x310   :  { %1542 = vmatpush3.bf16.msra.mxu1 %v1654_v20 }
 0x311   :  { %1543 = vmatprep.subr.bf16.mxu1 %v1710_v38 }
 0x314   :  { %1544 = vmatpush3.bf16.msra.mxu1 %v1655_v21 }
 0x315   :  { %1545 = vmatprep.subr.bf16.mxu1 %v1710_v38 }
 0x318   :  { %1546 = vmatpush3.bf16.msra.mxu1 %v1656_v32 }
 0x319   :  { %1547 = vmatprep.subr.bf16.mxu1 %v1710_v38  ;;  %v1325_v38 = vld [vmem:[%s1862_s3 + $0x5] ss:$0 sm:$0xff] }
 0x31c   :  { %1548 = vmatpush3.bf16.msra.mxu1 %v1657_v33 }
 0x3d2   :  { %v988_v23 = vpop.f32.mrb[12].mxu1 }
 0x3d3   :  { %v989_v24 = vadd.f32 %v1307_v22, %v988_v23  ;;  %v1511_v25 = vpop.f32.mrb[13].mxu1 }
 0x3d4   :  { %v991_v26 = vpop.f32.mrb[14].mxu1 }
 0x3d5   :  { %v992_v27 = vadd.f32 %v1307_v22, %v991_v26  ;;  %v1512_v28 = vpop.f32.mrb[15].mxu1  ;;  %v995_v29 = vmax.f32 %v989_v24, 0.0 }
 0x3d7   :  { %v996_v30 = vmax.f32 %v992_v27, 0.0 }
 0x3d9   :  { %v997_v31 = vpack.c.bf16 %v996_v30, %v995_v29 }
 0x3db   :  { %1530 = vmatmul.mubr.bf16.vlgmr.msra.gmra.mrb[12].mxu0 %v997_v31 }
 0x4ae   :  { %v1102_v35 = vpop.f32.mrb[12].mxu0 }
 0x4af   :  { %v1103_v36 = vadd.f32 %v1316_v34, %v1102_v35  ;;  %v1531_v37 = vpop.f32.mrb[13].mxu0 }
 0x4b0   :  { %v1105_v39 = vpop.f32.mrb[14].mxu0 }
 0x4b1   :  { %v1106_v40 = vadd.f32 %v1316_v34, %v1105_v39  ;;  %v1532_v41 = vpop.f32.mrb[15].mxu0  ;;  %v1109_v42 = vmax.f32 %v1103_v36, 0.0 }
 0x4b3   :  { %v1110_v43 = vmax.f32 %v1106_v40, 0.0 }
 0x4b5   :  { %v1111_v44 = vpack.c.bf16 %v1110_v43, %v1109_v42 }
 0x4b7   :  { %1550 = vmatmul.mubr.bf16.vlgmr.msra.gmra.mrb[16].mxu1 %v1111_v44 }
 0x58a   :  { %v1216_v45 = vpop.f32.mrb[16].mxu1 }
 0x58b   :  { %v1217_v46 = vadd.f32 %v1325_v38, %v1216_v45  ;;  %v1551_v47 = vpop.f32.mrb[17].mxu1 }
 0x58c   :  { %v1219_v48 = vpop.f32.mrb[18].mxu1 }
 0x58d   :  { %1223 = vst [vmem:[%s1863_s4] sm:$0xff] %v1217_v46  ;;  %v1220_v49 = vadd.f32 %v1325_v38, %v1219_v48  ;;  %v1552_v50 = vpop.f32.mrb[19].mxu1 }
 0x58f   :  { %1224 = vst [vmem:[%s1863_s4 + $0x8] sm:$0xff] %v1220_v49 }
 0x590   :  { %1229 = vsyncpa [#allocation3], 1 }
 0x591   :  { %1230 = vsyncpa [#allocation5], 1 }

</bundles_post_ra>
